<compile_context>
chip_gen: v7x
topology: tpu7x:2x2x1
jax: 0.10.0
libtpu: 0.0.40
codegen_flags: <defaults>
</compile_context>

<pallas_src>
import functools

import jax
import jax.numpy as jnp
from jax.experimental import pallas as pl
from jax.experimental.pallas import tpu as pltpu


def _ceil_to(a, m):
    return ((a + m - 1) // m) * m


def _vmem_physical_bytes():
    """Physical VMEM capacity; conservative fallback if the query fails."""
    try:
        return int(pltpu.get_tpu_info().vmem_capacity_bytes)
    except Exception:  # pragma: no cover - older jax / non-TPU trace
        return 64 << 20  # v7x per-TC size: the safe (small) assumption


def _pick_tm(n_rows, tm_cap):
    """Row-tile size: MXU-friendly, divides N (no row padding), >= 2 tiles."""
    for cand in (1024, 512, 256, 128):
        if cand <= tm_cap and n_rows % cand == 0 and n_rows // cand >= 2:
            return cand
    for cand in (1024, 512, 256, 128):
        if cand <= tm_cap and n_rows % cand == 0:
            return cand
    # Small / ragged N: a single padded tile (rows padded to a sublane multiple).
    return min(tm_cap, _ceil_to(n_rows, 16))


def _pick_th(hp, cap=512):
    """Hidden chunk: prefer 256-aligned (256x256 MXU), fall back to 128."""
    for step in (256, 128):
        th = (min(cap, hp) // step) * step
        while th >= step:
            if hp % th == 0:
                return th
            th -= step
    return min(hp, 128)


# ---------------------------------------------------------------------------
# Kernels
# ---------------------------------------------------------------------------
def _mlp_fused_kernel(x_ref, w1_ref, b1_ref, w2_ref, b2_ref, o_ref):
    """Weights fully resident; grid iterates over row tiles only."""
    x = x_ref[...].astype(w1_ref.dtype)  # in-kernel cast to MXU dtype
    h = jnp.dot(x, w1_ref[...], preferred_element_type=jnp.float32)
    h = jnp.maximum(h + b1_ref[...], 0.0)
    # (dropout p=0.0 -> identity)
    o = jnp.dot(h.astype(w2_ref.dtype), w2_ref[...],
                preferred_element_type=jnp.float32)
    o_ref[...] = (o + b2_ref[...]).astype(o_ref.dtype)
    # (dropout p=0.0 -> identity)


def _mlp_fused_hchunk_kernel(x_ref, w1_ref, b1_ref, w2_ref, b2_ref, o_ref,
                             acc_ref, *, th, n_chunks):
    """Weights resident, hidden dim chunked inside the kernel (static unroll).

    Live intermediate is only (tm, th); exact because ReLU is elementwise per
    hidden unit and the fc2 contraction sums over hidden chunks.
    """
    x = x_ref[...].astype(w1_ref.dtype)
    acc_ref[...] = jnp.zeros_like(acc_ref)
    for c in range(n_chunks):  # static offsets -> zero-cost VMEM views
        lo = c * th
        h = jnp.dot(x, w1_ref[:, lo:lo + th], preferred_element_type=jnp.float32)
        h = jnp.maximum(h + b1_ref[:, lo:lo + th], 0.0)
        acc_ref[...] += jnp.dot(h.astype(w2_ref.dtype), w2_ref[lo:lo + th, :],
                                preferred_element_type=jnp.float32)
    o_ref[...] = (acc_ref[...] + b2_ref[...]).astype(o_ref.dtype)


def _mlp_ktiled_kernel(x_ref, w1_ref, b1_ref, w2_ref, b2_ref, o_ref, acc_ref):
    """Hidden dim chunked on the grid: grid = (row tiles, hidden chunks)."""
    k = pl.program_id(1)

    @pl.when(k == 0)
    def _init():
        acc_ref[...] = jnp.zeros_like(acc_ref)

    x = x_ref[...].astype(w1_ref.dtype)
    h = jnp.dot(x, w1_ref[...], preferred_element_type=jnp.float32)
    h = jnp.maximum(h + b1_ref[...], 0.0)
    acc_ref[...] += jnp.dot(h.astype(w2_ref.dtype), w2_ref[...],
                            preferred_element_type=jnp.float32)

    @pl.when(k == pl.num_programs(1) - 1)
    def _finalize():
        o_ref[...] = (acc_ref[...] + b2_ref[...]).astype(o_ref.dtype)


# ---------------------------------------------------------------------------
# Wrapper
# ---------------------------------------------------------------------------
def mlp_transformer(x, w1, b1, w2, b2, *, tm=None, th=None, force_path=None,
                    compute_dtype=jnp.bfloat16):
    """relu(x @ w1 + b1) @ w2 + b2  (eval-mode dropout p=0.0).

    x:  (B, T, in_dim)
    w1: (in_dim, h_dim)   (PyTorch fc1.weight, pre-transposed)
    b1: (h_dim,)
    w2: (h_dim, out_d)    (PyTorch fc2.weight, pre-transposed)
    b2: (out_d,)
    force_path: None | "fused" | "fused_chunked" | "ktiled"  (testing hook)
    Returns (B, T, out_d) in x.dtype.
    """
    B, T, in_dim = x.shape
    h_dim = w1.shape[1]
    out_d = w2.shape[1]
    N = B * T
    out_dtype = x.dtype

    cbytes = jnp.dtype(compute_dtype).itemsize
    obytes = jnp.dtype(out_dtype).itemsize

    physical = _vmem_physical_bytes()
    budget = int(physical * 0.75)       # residency gate (per-TC on v7x)
    limit_cap = int(physical * 0.85)    # vmem_limit ceiling (headroom for Mosaic)

    # Lane-dense padding targets (multiples of 128); zero padding is exact here.
    Dp = _ceil_to(in_dim, 128)
    Hp = _ceil_to(h_dim, 128)
    Op = _ceil_to(out_d, 128)

    tm_cap = 1024 if budget >= (80 << 20) else 512  # bigger row tiles on 128 MiB parts
    if tm is None:
        tm = _pick_tm(N, tm_cap)
    assert tm % 8 == 0, "row tile must be a sublane multiple"
    Np = _ceil_to(N, tm)

    # x: avoid a wrapper-side pad/cast HBM round trip when already aligned; the
    # kernels cast to the MXU dtype on the fly.
    x2d = x.reshape(N, in_dim)
    if Np != N or Dp != in_dim:
        x2d = jnp.pad(x2d.astype(compute_dtype), ((0, Np - N), (0, Dp - in_dim)))
    xbytes = jnp.dtype(x2d.dtype).itemsize

    def _prep_weight(a, r, c):
        if a.shape == (r, c) and a.dtype == compute_dtype:
            return a  # already prepared -> no per-call cast/pad traffic
        return jnp.pad(a.astype(compute_dtype),
                       ((0, r - a.shape[0]), (0, c - a.shape[1])))

    def _prep_bias(b, c):
        bb = b.astype(jnp.float32)
        if c != b.shape[0]:
            bb = jnp.pad(bb, (0, c - b.shape[0]))
        return bb.reshape(1, c)

    w1p = _prep_weight(w1, Dp, Hp)
    w2p = _prep_weight(w2, Hp, Op)
    b1p = _prep_bias(b1, Hp)
    b2p = _prep_bias(b2, Op)
    # TODO(synk): for repeated calls, hoist the weight cast/pad above into
    # one-time parameter preparation so weights aren't re-streamed per call.

    # Hidden chunk width (fused_chunked / ktiled paths), 256-aligned preferred.
    th_c = _pick_th(Hp, 512) if th is None else th
    assert th_c % 128 == 0 and Hp % th_c == 0, "th must be a 128-multiple dividing Hp"
    n_chunks = Hp // th_c

    # ---- VMEM estimates (bytes), incl. in-kernel bf16 copies ----------------
    io_tiles = 2 * tm * Dp * xbytes + 2 * tm * Op * obytes          # dbl-buffered x/out
    resident_w = (Dp * Hp + Hp * Op) * cbytes + (Hp + Op) * 4       # Buffered(1)
    xcast = tm * Dp * cbytes if x2d.dtype != compute_dtype else 0   # in-kernel cast copy

    fused_est = io_tiles + resident_w + xcast + tm * Hp * (4 + cbytes)
    chunk_est = (io_tiles + resident_w + xcast
                 + tm * th_c * (4 + cbytes) + tm * Op * 4)
    ktile_est = (io_tiles + xcast
                 + 2 * (Dp * th_c + th_c * Op) * cbytes + 2 * th_c * 4 + Op * 4
                 + tm * th_c * (4 + cbytes) + tm * Op * 4)

    if force_path is None:
        if int(fused_est * 1.15) <= budget:
            path = "fused"
        elif int(chunk_est * 1.15) <= budget:
            path = "fused_chunked"
        else:
            path = "ktiled"
    else:
        path = force_path

    cost = pl.CostEstimate(
        flops=2 * N * in_dim * h_dim + 2 * N * h_dim * out_d,
        transcendentals=0,
        bytes_accessed=(N * in_dim * xbytes + (Dp * Hp + Hp * Op) * cbytes
                        + (Hp + Op) * 4 + N * out_d * obytes),
    )

    def _limit(est):
        return int(min(limit_cap, max(32 << 20, int(est * 1.4))))

    nosplit = pl.Buffered(1)  # grid-invariant operands: single-buffered residency

    if path == "fused":
        out2d = pl.pallas_call(
            _mlp_fused_kernel,
            out_shape=jax.ShapeDtypeStruct((Np, Op), out_dtype),
            grid_spec=pltpu.PrefetchScalarGridSpec(
                num_scalar_prefetch=0,
                grid=(Np // tm,),
                in_specs=[
                    pl.BlockSpec((tm, Dp), lambda i: (i, 0)),
                    pl.BlockSpec((Dp, Hp), lambda i: (0, 0), pipeline_mode=nosplit),
                    pl.BlockSpec((1, Hp), lambda i: (0, 0), pipeline_mode=nosplit),
                    pl.BlockSpec((Hp, Op), lambda i: (0, 0), pipeline_mode=nosplit),
                    pl.BlockSpec((1, Op), lambda i: (0, 0), pipeline_mode=nosplit),
                ],
                out_specs=pl.BlockSpec((tm, Op), lambda i: (i, 0)),
            ),
            compiler_params=pltpu.CompilerParams(
                dimension_semantics=("parallel",),
                vmem_limit_bytes=_limit(fused_est),
            ),
            cost_estimate=cost,
        )(x2d, w1p, b1p, w2p, b2p)
    elif path == "fused_chunked":
        kern = functools.partial(_mlp_fused_hchunk_kernel, th=th_c, n_chunks=n_chunks)
        out2d = pl.pallas_call(
            kern,
            out_shape=jax.ShapeDtypeStruct((Np, Op), out_dtype),
            grid_spec=pltpu.PrefetchScalarGridSpec(
                num_scalar_prefetch=0,
                grid=(Np // tm,),
                in_specs=[
                    pl.BlockSpec((tm, Dp), lambda i: (i, 0)),
                    pl.BlockSpec((Dp, Hp), lambda i: (0, 0), pipeline_mode=nosplit),
                    pl.BlockSpec((1, Hp), lambda i: (0, 0), pipeline_mode=nosplit),
                    pl.BlockSpec((Hp, Op), lambda i: (0, 0), pipeline_mode=nosplit),
                    pl.BlockSpec((1, Op), lambda i: (0, 0), pipeline_mode=nosplit),
                ],
                out_specs=pl.BlockSpec((tm, Op), lambda i: (i, 0)),
                scratch_shapes=[pltpu.VMEM((tm, Op), jnp.float32)],
            ),
            compiler_params=pltpu.CompilerParams(
                dimension_semantics=("parallel",),
                vmem_limit_bytes=_limit(chunk_est),
            ),
            cost_estimate=cost,
        )(x2d, w1p, b1p, w2p, b2p)
    else:  # "ktiled": weights streamed per row tile (only if they can't stay resident)
        out2d = pl.pallas_call(
            _mlp_ktiled_kernel,
            out_shape=jax.ShapeDtypeStruct((Np, Op), out_dtype),
            grid_spec=pltpu.PrefetchScalarGridSpec(
                num_scalar_prefetch=0,
                grid=(Np // tm, n_chunks),
                in_specs=[
                    pl.BlockSpec((tm, Dp), lambda i, k: (i, 0)),
                    pl.BlockSpec((Dp, th_c), lambda i, k: (0, k)),
                    pl.BlockSpec((1, th_c), lambda i, k: (0, k)),
                    pl.BlockSpec((th_c, Op), lambda i, k: (k, 0)),
                    pl.BlockSpec((1, Op), lambda i, k: (0, 0), pipeline_mode=nosplit),
                ],
                out_specs=pl.BlockSpec((tm, Op), lambda i, k: (i, 0)),
                scratch_shapes=[pltpu.VMEM((tm, Op), jnp.float32)],
            ),
            compiler_params=pltpu.CompilerParams(
                dimension_semantics=("parallel", "arbitrary"),
                vmem_limit_bytes=_limit(ktile_est),
            ),
            cost_estimate=cost,
        )(x2d, w1p, b1p, w2p, b2p)

    if Np != N or Op != out_d:
        out2d = out2d[:N, :out_d]
    return out2d.reshape(B, T, out_d)


def reference_mlp(x, w1, b1, w2, b2):
    h = jnp.maximum(jnp.einsum("btd,dh->bth", x, w1) + b1, 0.0)
    return jnp.einsum("bth,ho->bto", h, w2) + b2


if __name__ == "__main__":
    key = jax.random.PRNGKey(0)
    kx, kw1, kb1, kw2, kb2 = jax.random.split(key, 5)

    batch, seq, in_dim = 4, 8, 32
    out_d = in_dim  # module default: out_d = in_dim

    x = jax.random.normal(kx, (batch, seq, in_dim), dtype=jnp.float32)

    # --- Test 1: default path (fused, resident weights) ----------------------
    h_dim = 64
    w1 = jax.random.normal(kw1, (in_dim, h_dim), dtype=jnp.float32) * 0.05
    b1 = jax.random.normal(kb1, (h_dim,), dtype=jnp.float32) * 0.05
    w2 = jax.random.normal(kw2, (h_dim, out_d), dtype=jnp.float32) * 0.05
    b2 = jax.random.normal(kb2, (out_d,), dtype=jnp.float32) * 0.05

    out = jax.block_until_ready(mlp_transformer(x, w1, b1, w2, b2))
    ref = reference_mlp(x, w1, b1, w2, b2)
    assert out.shape == (batch, seq, out_d)
    # bf16 MXU operands with f32 accumulation -> bf16-level tolerance.
    assert jnp.allclose(out, ref, atol=2e-2, rtol=2e-2), \
        float(jnp.max(jnp.abs(out - ref)))

    # --- Test 2: forced fused path with in-kernel hidden chunking ------------
    h_dim2 = 200  # pads to 256 -> two hidden chunks of 128
    w1b = jax.random.normal(kw1, (in_dim, h_dim2), dtype=jnp.float32) * 0.05
    b1b = jax.random.normal(kb1, (h_dim2,), dtype=jnp.float32) * 0.05
    w2b = jax.random.normal(kw2, (h_dim2, out_d), dtype=jnp.float32) * 0.05
    ref2 = reference_mlp(x, w1b, b1b, w2b, b2)

    out2 = jax.block_until_ready(
        mlp_transformer(x, w1b, b1b, w2b, b2, th=128, force_path="fused_chunked"))
    assert out2.shape == (batch, seq, out_d)
    assert jnp.allclose(out2, ref2, atol=2e-2, rtol=2e-2), \
        float(jnp.max(jnp.abs(out2 - ref2)))

    # --- Test 3: forced grid-reduction (k-tiled) path -------------------------
    out3 = jax.block_until_ready(
        mlp_transformer(x, w1b, b1b, w2b, b2, th=128, force_path="ktiled"))
    assert out3.shape == (batch, seq, out_d)
    assert jnp.allclose(out3, ref2, atol=2e-2, rtol=2e-2), \
        float(jnp.max(jnp.abs(out3 - ref2)))

    print("KERNEL_OK")
</pallas_src>

<mosaic_0001>
module attributes {stable_mosaic.version = 11 : i64} {
  func.func @_mlp_fused_kernel(%arg0: i32, %arg1: memref<32x128xbf16, #tpu.memory_space<vmem>>, %arg2: memref<128x128xbf16, #tpu.memory_space<vmem>>, %arg3: memref<1x128xf32, #tpu.memory_space<vmem>>, %arg4: memref<128x128xbf16, #tpu.memory_space<vmem>>, %arg5: memref<1x128xf32, #tpu.memory_space<vmem>>, %arg6: memref<32x128xf32, #tpu.memory_space<vmem>>) attributes {dimension_semantics = [#tpu.dimension_semantics<parallel>], iteration_bounds = array<i64: 1>, scalar_prefetch = 0 : i64, scratch_operands = 0 : i64, tpu.core_type = #tpu.core_type<tc>, window_params = [{transform_indices = @transform_0, window_bounds = array<i64: 32, 128>}, {pipeline_mode = #tpu.pipeline_mode<synchronous>, transform_indices = @transform_1, window_bounds = array<i64: 128, 128>}, {pipeline_mode = #tpu.pipeline_mode<synchronous>, transform_indices = @transform_2, window_bounds = array<i64: 1, 128>}, {pipeline_mode = #tpu.pipeline_mode<synchronous>, transform_indices = @transform_3, window_bounds = array<i64: 128, 128>}, {pipeline_mode = #tpu.pipeline_mode<synchronous>, transform_indices = @transform_4, window_bounds = array<i64: 1, 128>}, {transform_indices = @transform_5, window_bounds = array<i64: 32, 128>}]} {
    %c0 = arith.constant 0 : index
    %c0_0 = arith.constant 0 : index
    %0 = vector.load %arg1[%c0, %c0_0] : memref<32x128xbf16, #tpu.memory_space<vmem>>, vector<32x128xbf16>
    %c0_1 = arith.constant 0 : index
    %c0_2 = arith.constant 0 : index
    %1 = vector.load %arg2[%c0_1, %c0_2] : memref<128x128xbf16, #tpu.memory_space<vmem>>, vector<128x128xbf16>
    %cst = arith.constant dense<0.000000e+00> : vector<32x128xf32>
    %2 = tpu.matmul %0, %1, %cst {dimension_numbers = #tpu.dot_dimension_numbers<[1], [0], [0], [1], [0, 0, 1, 1], [], []>} : vector<32x128xbf16>, vector<128x128xbf16>, vector<32x128xf32> -> vector<32x128xf32>
    %c0_3 = arith.constant 0 : index
    %c0_4 = arith.constant 0 : index
    %3 = vector.load %arg3[%c0_3, %c0_4] : memref<1x128xf32, #tpu.memory_space<vmem>>, vector<1x128xf32>
    %4 = vector.broadcast %3 : vector<1x128xf32> to vector<32x128xf32>
    %5 = arith.addf %2, %4 : vector<32x128xf32>
    %cst_5 = arith.constant 0.000000e+00 : f32
    %6 = vector.broadcast %cst_5 : f32 to vector<32x128xf32>
    %7 = arith.maximumf %5, %6 : vector<32x128xf32>
    %8 = arith.truncf %7 : vector<32x128xf32> to vector<32x128xbf16>
    %c0_6 = arith.constant 0 : index
    %c0_7 = arith.constant 0 : index
    %9 = vector.load %arg4[%c0_6, %c0_7] : memref<128x128xbf16, #tpu.memory_space<vmem>>, vector<128x128xbf16>
    %cst_8 = arith.constant dense<0.000000e+00> : vector<32x128xf32>
    %10 = tpu.matmul %8, %9, %cst_8 {dimension_numbers = #tpu.dot_dimension_numbers<[1], [0], [0], [1], [0, 0, 1, 1], [], []>} : vector<32x128xbf16>, vector<128x128xbf16>, vector<32x128xf32> -> vector<32x128xf32>
    %c0_9 = arith.constant 0 : index
    %c0_10 = arith.constant 0 : index
    %11 = vector.load %arg5[%c0_9, %c0_10] : memref<1x128xf32, #tpu.memory_space<vmem>>, vector<1x128xf32>
    %12 = vector.broadcast %11 : vector<1x128xf32> to vector<32x128xf32>
    %13 = arith.addf %10, %12 : vector<32x128xf32>
    %c0_11 = arith.constant 0 : index
    %c0_12 = arith.constant 0 : index
    %14 = vector.load %arg6[%c0_11, %c0_12] : memref<32x128xf32, #tpu.memory_space<vmem>>, vector<32x128xf32>
    tpu.vector_store %arg6[%c0_11, %c0_12], %13 {strides = array<i32>} : memref<32x128xf32, #tpu.memory_space<vmem>>, vector<32x128xf32>,
    return
  }
  func.func @transform_0(%arg0: i32) -> (i32, i32) {
    %c0_i32 = arith.constant 0 : i32
    %c0_i32_0 = arith.constant 0 : i32
    return %arg0, %c0_i32 : i32, i32
  }
  func.func @transform_1(%arg0: i32) -> (i32, i32) {
    %c0_i32 = arith.constant 0 : i32
    %c0_i32_0 = arith.constant 0 : i32
    %c0_i32_1 = arith.constant 0 : i32
    return %c0_i32, %c0_i32_0 : i32, i32
  }
  func.func @transform_2(%arg0: i32) -> (i32, i32) {
    %c0_i32 = arith.constant 0 : i32
    %c0_i32_0 = arith.constant 0 : i32
    %c0_i32_1 = arith.constant 0 : i32
    return %c0_i32, %c0_i32_0 : i32, i32
  }
  func.func @transform_3(%arg0: i32) -> (i32, i32) {
    %c0_i32 = arith.constant 0 : i32
    %c0_i32_0 = arith.constant 0 : i32
    %c0_i32_1 = arith.constant 0 : i32
    return %c0_i32, %c0_i32_0 : i32, i32
  }
  func.func @transform_4(%arg0: i32) -> (i32, i32) {
    %c0_i32 = arith.constant 0 : i32
    %c0_i32_0 = arith.constant 0 : i32
    %c0_i32_1 = arith.constant 0 : i32
    return %c0_i32, %c0_i32_0 : i32, i32
  }
  func.func @transform_5(%arg0: i32) -> (i32, i32) {
    %c0_i32 = arith.constant 0 : i32
    %c0_i32_0 = arith.constant 0 : i32
    return %arg0, %c0_i32 : i32, i32
  }
}

</mosaic_0001>

<bundles_post_ra>
// kernel: tpu_custom_call.1
= control target key start
LH: loop header
LB: loop body
LE: loop exit
PB: predicated region body
PF: predicated region fallthrough
CT: control target
= control target key end

     0   :  { %10 = vsyncpa [#allocation3], 0  ;;  %s655_s0 = inlined_call_operand.hbm [shape: bf16[32,128], index: 0, kind: input, shape index: {}]   ;;  %s656_s1 = inlined_call_operand.hbm [shape: bf16[128,128], index: 1, kind: input, shape index: {}]   ;;  %s657_s2 = inlined_call_operand.vmem [shape: f32[1,128], index: 2, kind: input, shape index: {}]   ;;  %s658_s3 = inlined_call_operand.hbm [shape: bf16[128,128], index: 3, kind: input, shape index: {}]   ;;  %s659_s4 = inlined_call_operand.vmem [shape: f32[1,128], index: 4, kind: input, shape index: {}]   ;;  %s660_s5 = inlined_call_operand.hbm [shape: f32[32,128], index: 5, kind: output, shape index: {}]  }
   0x1   :  { %11 = vsyncpa [#allocation6], 0 }
   0x2   :  { %12 = vsyncpa [#allocation4], 0  ;;  %s547_s18 = smov [#allocation5]   ;;  %s548_s20 = smov [#allocation2]  }
   0x3   :  { %s30_s19 = sshll.u32 %s547_s18, 4  ;;  %s18_s21 = sshll.u32 %s548_s20, 4  ;;  %s31_s19 = int_to_ptr.vmem [resolvable:$true] %s30_s19  ;;  %s585_s21 = int_to_ptr.vmem [resolvable:$true] %s18_s21 }
   0x4   :  { %s453_s24 = scalar_lea.hbm %s656_s1, 1024 }
   0x5   :  { %p454_p0 = scmp.ne.s32.totalorder %s656_s1, %s453_s24  ;;  %p457_p1 = scmp.lt.u32.totalorder %s453_s24, %s656_s1 }
   0x7   :  { %p459_p2 = pnand %p457_p1, %p454_p0 }
   0x9   :  { %462 = shalt.err (!%p459_p2)
}
   0xa   :  { %s463_s29 = scalar_lea.vmem %s31_s19, 1024  ;;  %p468_p4 = scmp.lt.s32.totalorder %s31_s19, %s31_s19 }
   0xb   :  { %p464_p3 = scmp.ne.s32.totalorder %s31_s19, %s463_s29  ;;  %p469_p5 = scmp.lt.s32.totalorder %s463_s29, %s463_s29 }
   0xd   :  { %p470_p6 = por %p469_p5, %p468_p4 }
   0xf   :  { %p471_p7 = pnand %p470_p6, %p464_p3 }
  0x11   :  { %474 = shalt.err (!%p471_p7)
}
  0x12   :  { %s549_s30 = smov 64   ;;  %s550_s6 = smov 4  }
  0x13   :  { %36 = dma.hbm_to_vmem [thread:$0]  %s656_s1, 1024, %s31_s19, [#allocation6], %s549_s30, %s549_s30, %s550_s6  }
  0x14   :  { %s475_s11 = scalar_lea.hbm %s655_s0, 256 }
  0x15   :  { %p476_p8 = scmp.ne.s32.totalorder %s655_s0, %s475_s11  ;;  %p479_p9 = scmp.lt.u32.totalorder %s475_s11, %s655_s0 }
  0x17   :  { %p481_p10 = pnand %p479_p9, %p476_p8 }
  0x19   :  { %484 = shalt.err (!%p481_p10)
}
  0x1a   :  { %s485_s16 = scalar_lea.vmem %s585_s21, 256  ;;  %p490_p12 = scmp.lt.s32.totalorder %s585_s21, %s585_s21 }
  0x1b   :  { %p486_p11 = scmp.ne.s32.totalorder %s585_s21, %s485_s16  ;;  %p491_p13 = scmp.lt.s32.totalorder %s485_s16, %s485_s16 }
  0x1d   :  { %p492_p0 = por %p491_p13, %p490_p12 }
  0x1f   :  { %p493_p1 = pnand %p492_p0, %p486_p11 }
  0x21   :  { %496 = shalt.err (!%p493_p1)
}
  0x22   :  { %24 = dma.hbm_to_vmem [thread:$0]  %s655_s0, 256, %s585_s21, [#allocation3], %s549_s30, %s549_s30, %s550_s6  }
  0x23   :  { %s551_s18 = smov [#allocation7]   ;;  %s497_s23 = scalar_lea.hbm %s658_s3, 1024 }
  0x24   :  { %s44_s19 = sshll.u32 %s551_s18, 4  ;;  %p498_p2 = scmp.ne.s32.totalorder %s658_s3, %s497_s23  ;;  %s45_s19 = int_to_ptr.vmem [resolvable:$true] %s44_s19 }
  0x25   :  { %p501_p3 = scmp.lt.u32.totalorder %s497_s23, %s658_s3 }
  0x27   :  { %p503_p4 = pnand %p501_p3, %p498_p2 }
  0x29   :  { %506 = shalt.err (!%p503_p4)
}
  0x2a   :  { %s507_s28 = scalar_lea.vmem %s45_s19, 1024  ;;  %p512_p6 = scmp.lt.s32.totalorder %s45_s19, %s45_s19 }
  0x2b   :  { %p508_p5 = scmp.ne.s32.totalorder %s45_s19, %s507_s28  ;;  %p513_p7 = scmp.lt.s32.totalorder %s507_s28, %s507_s28 }
  0x2d   :  { %p514_p8 = por %p513_p7, %p512_p6 }
  0x2f   :  { %p515_p9 = pnand %p514_p8, %p508_p5 }
  0x31   :  { %518 = shalt.err (!%p515_p9)
}
  0x32   :  { %50 = dma.hbm_to_vmem [thread:$0]  %s658_s3, 1024, %s45_s19, [#allocation6], %s549_s30, %s549_s30, %s550_s6  }
  0x33   :  { %541 = dma.done.wait [#allocation3], 256  }
  0x34   :  { %542 = vsyncadd [#allocation3], 4294967040 }
  0x35   :  { %543 = dma.done.wait [#allocation6], 2048  }
  0x36   :  { %544 = vsyncadd [#allocation6], 4294965248  ;;  %v435_v0 = vld [vmem:[#allocation5] sm:$0xff]   ;;  %v436_v1 = vld [vmem:[#allocation5 + $0x8] sm:$0xff]  }
  0x37   :  { %387 = vmatprep.subr.bf16.mxu0 %v435_v0  ;;  %v437_v2 = vld [vmem:[#allocation5 + $0x10] sm:$0xff]   ;;  %v438_v3 = vld [vmem:[#allocation5 + $0x18] sm:$0xff]   ;;  %v445_v5 = vld [vmem:[#allocation7] sm:$0xff]  }
  0x38   :  { %388 = vmatpush3.bf16.msra.mxu0 %v435_v0  ;;  %v443_v4 = vld [vmem:[#allocation2] sm:$0xff]   ;;  %v446_v6 = vld [vmem:[#allocation7 + $0x8] sm:$0xff]   ;;  %v439_v7 = vld [vmem:[#allocation5 + $0x20] sm:$0xff]   ;;  %407 = vmatprep.subr.bf16.mxu1 %v445_v5 }
  0x39   :  { %389 = vmatprep.subr.bf16.mxu0 %v436_v1  ;;  %403 = vmatprep.mubr.bf16.mxu0 %v443_v4  ;;  %v447_v8 = vld [vmem:[#allocation7 + $0x10] sm:$0xff]   ;;  %v440_v9 = vld [vmem:[#allocation5 + $0x28] sm:$0xff]   ;;  %v448_v10 = vld [vmem:[#allocation7 + $0x18] sm:$0xff]  }
  0x3a   :  { %408 = vmatpush3.bf16.msra.mxu1 %v445_v5  ;;  %v441_v11 = vld [vmem:[#allocation5 + $0x30] sm:$0xff]   ;;  %v449_v12 = vld [vmem:[#allocation7 + $0x20] sm:$0xff]   ;;  %v442_v13 = vld [vmem:[#allocation5 + $0x38] sm:$0xff]  }
  0x3b   :  { %409 = vmatprep.subr.bf16.mxu1 %v446_v6  ;;  %v450_v14 = vld [vmem:[#allocation7 + $0x28] sm:$0xff]   ;;  %v444_v15 = vld [vmem:[#allocation2 + $0x8] sm:$0xff]   ;;  %v451_v16 = vld [vmem:[#allocation7 + $0x30] sm:$0xff]  }
  0x3c   :  { %390 = vmatpush3.bf16.msra.mxu0 %v436_v1  ;;  %v452_v17 = vld [vmem:[#allocation7 + $0x38] sm:$0xff]   ;;  %v347_v18 = vld [vmem:[%s657_s2] ss:$0 sm:$0xff]  ;;  %s552_s2 = smov [#allocation8]  }
  0x3d   :  { %391 = vmatprep.subr.bf16.mxu0 %v437_v2  ;;  %v358_v33 = vld [vmem:[%s659_s4] ss:$0 sm:$0xff]  ;;  %s334_s7 = sshll.u32 %s552_s2, 4  ;;  %s335_s7 = int_to_ptr.vmem [resolvable:$true] %s334_s7 }
  0x3e   :  { %410 = vmatpush3.bf16.msra.mxu1 %v446_v6  ;;  %s519_s8 = scalar_lea.vmem %s335_s7, 512  ;;  %p524_p11 = scmp.lt.s32.totalorder %s335_s7, %s335_s7 }
  0x3f   :  { %411 = vmatprep.subr.bf16.mxu1 %v447_v8  ;;  %p520_p10 = scmp.ne.s32.totalorder %s335_s7, %s519_s8  ;;  %p525_p12 = scmp.lt.s32.totalorder %s519_s8, %s519_s8 }
  0x40   :  { %392 = vmatpush3.bf16.msra.mxu0 %v437_v2 }
  0x41   :  { %393 = vmatprep.subr.bf16.mxu0 %v438_v3  ;;  %p526_p13 = por %p525_p12, %p524_p11 }
  0x42   :  { %412 = vmatpush3.bf16.msra.mxu1 %v447_v8 }
  0x43   :  { %413 = vmatprep.subr.bf16.mxu1 %v448_v10  ;;  %p527_p0 = pnand %p526_p13, %p520_p10 }
  0x44   :  { %394 = vmatpush3.bf16.msra.mxu0 %v438_v3 }
  0x45   :  { %395 = vmatprep.subr.bf16.mxu0 %v439_v7 }
  0x46   :  { %414 = vmatpush3.bf16.msra.mxu1 %v448_v10 }
  0x47   :  { %415 = vmatprep.subr.bf16.mxu1 %v449_v12 }
  0x48   :  { %396 = vmatpush3.bf16.msra.mxu0 %v439_v7 }
  0x49   :  { %397 = vmatprep.subr.bf16.mxu0 %v440_v9 }
  0x4a   :  { %416 = vmatpush3.bf16.msra.mxu1 %v449_v12 }
  0x4b   :  { %417 = vmatprep.subr.bf16.mxu1 %v450_v14 }
  0x4c   :  { %398 = vmatpush3.bf16.msra.mxu0 %v440_v9 }
  0x4d   :  { %399 = vmatprep.subr.bf16.mxu0 %v441_v11 }
  0x4e   :  { %418 = vmatpush3.bf16.msra.mxu1 %v450_v14 }
  0x4f   :  { %419 = vmatprep.subr.bf16.mxu1 %v451_v16 }
  0x50   :  { %400 = vmatpush3.bf16.msra.mxu0 %v441_v11 }
  0x51   :  { %401 = vmatprep.subr.bf16.mxu0 %v442_v13 }
  0x52   :  { %420 = vmatpush3.bf16.msra.mxu1 %v451_v16 }
  0x53   :  { %421 = vmatprep.subr.bf16.mxu1 %v452_v17 }
  0x54   :  { %402 = vmatpush3.bf16.msra.mxu0 %v442_v13 }
  0x56   :  { %422 = vmatpush3.bf16.msra.mxu1 %v452_v17 }
  0x57   :  { %404 = vmatmul.mubr.bf16.vlgmr.msra.gmra.mrb[0].mxu0 %v444_v15 }
 0x12a   :  { %v405_v19 = vpop.f32.mrb[0].mxu0 }
 0x12b   :  { %v193_v20 = vadd.f32 %v405_v19, %v347_v18  ;;  %v184_v21 = vpop.f32.mrb[1].mxu0 }
 0x12c   :  { %v185_v22 = vadd.f32 %v347_v18, %v184_v21  ;;  %v406_v23 = vpop.f32.mrb[2].mxu0 }
 0x12d   :  { %v196_v24 = vadd.f32 %v406_v23, %v347_v18  ;;  %v187_v25 = vpop.f32.mrb[3].mxu0  ;;  %v201_v27 = vmax.f32 %v193_v20, 0.0 }
 0x12e   :  { %v188_v26 = vadd.f32 %v347_v18, %v187_v25  ;;  %v199_v29 = vmax.f32 %v185_v22, 0.0 }
 0x12f   :  { %v202_v28 = vmax.f32 %v196_v24, 0.0 }
 0x130   :  { %v200_v30 = vmax.f32 %v188_v26, 0.0 }
 0x131   :  { %v204_v31 = vpack.c.bf16 %v202_v28, %v201_v27 }
 0x132   :  { %v203_v32 = vpack.c.bf16 %v200_v30, %v199_v29 }
 0x134   :  { %423 = vmatprep.mubr.bf16.mxu1 %v203_v32 }
 0x135   :  { %424 = vmatmul.mubr.bf16.vlgmr.msra.gmra.mrb[0].mxu1 %v204_v31 }
 0x208   :  { %v425_v34 = vpop.f32.mrb[0].mxu1 }
 0x209   :  { %v319_v35 = vadd.f32 %v425_v34, %v358_v33  ;;  %v310_v36 = vpop.f32.mrb[1].mxu1 }
 0x20a   :  { %v311_v37 = vadd.f32 %v358_v33, %v310_v36  ;;  %v426_v38 = vpop.f32.mrb[2].mxu1 }
 0x20b   :  { %327 = vst [vmem:[#allocation8 + $0x10] sm:$0xff] %v319_v35  ;;  %v322_v39 = vadd.f32 %v426_v38, %v358_v33  ;;  %v313_v40 = vpop.f32.mrb[3].mxu1 }
 0x20c   :  { %325 = vst [vmem:[#allocation8] sm:$0xff] %v311_v37  ;;  %v314_v41 = vadd.f32 %v358_v33, %v313_v40 }
 0x20d   :  { %328 = vst [vmem:[#allocation8 + $0x18] sm:$0xff] %v322_v39 }
 0x20e   :  { %326 = vst [vmem:[#allocation8 + $0x8] sm:$0xff] %v314_v41 }
 0x20f   :  { %530 = shalt.err (!%p527_p0)
}
 0x210   :  { %s531_s10 = scalar_lea.hbm %s660_s5, 512 }
 0x211   :  { %p532_p1 = scmp.ne.s32.totalorder %s660_s5, %s531_s10  ;;  %p535_p2 = scmp.lt.u32.totalorder %s531_s10, %s660_s5 }
 0x213   :  { %p537_p3 = pnand %p535_p2, %p532_p1 }
 0x215   :  { %540 = shalt.err (!%p537_p3)
}
 0x216   :  { %s553_s15 = smov 128   ;;  %s554_s16 = smov 8  }
 0x217   :  { %340 = dma.vmem_to_hbm [thread:$0]  %s335_s7, 512, %s660_s5, [#allocation4], %s553_s15, %s553_s15, %s554_s16  }
 0x218   :  { %545 = dma.done.wait [#allocation4], 512  }
 0x219   :  { %546 = vsyncadd [#allocation4], 4294966784 }
 0x21a   :  { %344 = vsyncpa [#allocation3], 1 }
 0x21b   :  { %345 = vsyncpa [#allocation6], 1 }
 0x21c   :  { %346 = vsyncpa [#allocation4], 1 }

</bundles_post_ra>
